<compile_context>
chip_gen: v5e
topology: v5e:2x2
jax: 0.10.0
libtpu: 0.0.40
codegen_flags: <defaults>
</compile_context>

<pallas_src>
import functools

import jax
import jax.numpy as jnp
from jax.experimental import pallas as pl
from jax.experimental.pallas import tpu as pltpu

IN_FEATURES = 512
OUT_FEATURES = 10
_LANE = 128  # VMEM last-dim padding granularity (for the VMEM budget estimate)


def _default_tile_b():
    """Generation-aware batch tile (rows of x per grid step)."""
    try:
        kind = jax.devices()[0].device_kind.lower()
    except Exception:  # pragma: no cover - no devices / interpret fallback
        return 1024
    if "v7" in kind:
        return 4096   # 8 MiB x-tile; 16 MiB double-buffered (64 MiB physical VMEM)
    if "v6" in kind:
        return 4096   # fits the 32 MiB scoped-VMEM default with room to spare
    if "v5" in kind:
        return 2048   # 8 MiB double-buffered: fits v5e's 16 MiB scoped default
    return 1024       # unknown backend (e.g. CPU interpret): conservative


def _vmem_limit_bytes(tile_b, x_itemsize):
    """Tile footprint (double-buffered, lane-padded) + headroom, capped at 48 MiB."""
    x_bufs = 2 * tile_b * IN_FEATURES * x_itemsize
    out_bufs = 2 * tile_b * _LANE * 4          # out last dim pads to 128 lanes in VMEM
    w_bufs = 2 * IN_FEATURES * _LANE * 4
    b_bufs = 2 * 8 * _LANE * 4
    total = x_bufs + out_bufs + w_bufs + b_bufs + (4 << 20)   # internal-scratch headroom
    return int(min(max(total, 32 << 20), 48 << 20))           # 48 MiB < 64 MiB (v7x)


def output_layer_kernel(x_ref, w_ref, b_ref, o_ref):
    # MXU matmul with f32 accumulation, bias add on VPU.
    logits = jnp.dot(x_ref[...], w_ref[...],
                     preferred_element_type=jnp.float32) + b_ref[...].astype(jnp.float32)
    # Numerically stable softmax over the class axis (== nn.Softmax(dim=1)).
    m = jnp.max(logits, axis=-1, keepdims=True)
    e = jnp.exp(logits - m)
    denom = jnp.sum(e, axis=-1, keepdims=True)
    # Exact division: keeps row sums at 1.0 to f32 precision; this kernel is
    # HBM-bound, so the EUP-approximate reciprocal bought nothing.
    o_ref[...] = (e / denom).astype(o_ref.dtype)


@functools.partial(jax.jit, static_argnames=("tile_b",))
def output_layer(x, w, b, *, tile_b=None):
    """x: [B, 512] (f32 or bf16), w: [512, 10] f32, b: [1, 10] f32 -> softmax probs [B, 10]."""
    B = x.shape[0]
    if tile_b is None:
        tile_b = _default_tile_b()
    tile_b = min(tile_b, B)
    grid = (pl.cdiv(B, tile_b),)

    cost = pl.CostEstimate(
        flops=2 * B * IN_FEATURES * OUT_FEATURES,
        transcendentals=B * OUT_FEATURES,
        bytes_accessed=(x.dtype.itemsize * B * IN_FEATURES      # x read (dominant)
                        + x.dtype.itemsize * B * OUT_FEATURES   # output write
                        + 4 * (IN_FEATURES * OUT_FEATURES + OUT_FEATURES)),  # w + b
    )

    return pl.pallas_call(
        output_layer_kernel,
        out_shape=jax.ShapeDtypeStruct((B, OUT_FEATURES), x.dtype),
        grid=grid,
        in_specs=[
            # Streamed batch tiles of x (double-buffered by the pipeline).
            pl.BlockSpec((tile_b, IN_FEATURES), lambda i: (i, 0)),
            # Weight and bias stay resident in VMEM across all grid steps.
            pl.BlockSpec((IN_FEATURES, OUT_FEATURES), lambda i: (0, 0)),
            pl.BlockSpec((1, OUT_FEATURES), lambda i: (0, 0)),
        ],
        out_specs=pl.BlockSpec((tile_b, OUT_FEATURES), lambda i: (i, 0)),
        compiler_params=pltpu.CompilerParams(
            dimension_semantics=("parallel",),
            vmem_limit_bytes=_vmem_limit_bytes(tile_b, x.dtype.itemsize),
        ),
        cost_estimate=cost,
    )(x, w, b)


if __name__ == "__main__":
    key = jax.random.PRNGKey(0)
    kx, kw, kb = jax.random.split(key, 3)

    # Small demo batch; tile_b=8 gives grid=(2,) so the batch-tiled pipeline
    # path (the production configuration) is actually exercised.
    B = 16
    x = jax.random.normal(kx, (B, IN_FEATURES), dtype=jnp.float32)

    # Deterministic init mimicking nn.Linear default: U(-1/sqrt(in), 1/sqrt(in)).
    bound = 1.0 / (IN_FEATURES ** 0.5)
    w = jax.random.uniform(kw, (IN_FEATURES, OUT_FEATURES),
                           dtype=jnp.float32, minval=-bound, maxval=bound)
    b = jax.random.uniform(kb, (1, OUT_FEATURES),
                           dtype=jnp.float32, minval=-bound, maxval=bound)

    out = jax.block_until_ready(output_layer(x, w, b, tile_b=8))

    # Reference check in plain JAX.
    ref = jax.nn.softmax(x @ w + b, axis=1)
    assert out.shape == (B, OUT_FEATURES)
    max_err = float(jnp.max(jnp.abs(out - ref)))
    assert jnp.allclose(out, ref, atol=1e-5, rtol=1e-5), max_err
    assert jnp.allclose(jnp.sum(out, axis=1), 1.0, atol=1e-5)

    print("KERNEL_OK")
</pallas_src>

<mosaic_0001>
module attributes {stable_mosaic.version = 11 : i64} {
  func.func @output_layer_kernel(%arg0: i32, %arg1: memref<8x512xf32, #tpu.memory_space<vmem>>, %arg2: memref<512x10xf32, #tpu.memory_space<vmem>>, %arg3: memref<1x10xf32, #tpu.memory_space<vmem>>, %arg4: memref<8x10xf32, #tpu.memory_space<vmem>>) attributes {dimension_semantics = [#tpu.dimension_semantics<parallel>], iteration_bounds = array<i64: 2>, scalar_prefetch = 0 : i64, scratch_operands = 0 : i64, tpu.core_type = #tpu.core_type<tc>, window_params = [{transform_indices = @transform_0, window_bounds = array<i64: 8, 512>}, {pipeline_mode = #tpu.pipeline_mode<synchronous>, transform_indices = @transform_1, window_bounds = array<i64: 512, 10>}, {pipeline_mode = #tpu.pipeline_mode<synchronous>, transform_indices = @transform_2, window_bounds = array<i64: 1, 10>}, {transform_indices = @transform_3, window_bounds = array<i64: 8, 10>}]} {
    %c0 = arith.constant 0 : index
    %c0_0 = arith.constant 0 : index
    %0 = vector.load %arg1[%c0, %c0_0] : memref<8x512xf32, #tpu.memory_space<vmem>>, vector<8x512xf32>
    %c0_1 = arith.constant 0 : index
    %c0_2 = arith.constant 0 : index
    %1 = vector.load %arg2[%c0_1, %c0_2] : memref<512x10xf32, #tpu.memory_space<vmem>>, vector<512x10xf32>
    %cst = arith.constant dense<0.000000e+00> : vector<8x10xf32>
    %2 = tpu.matmul %0, %1, %cst {dimension_numbers = #tpu.dot_dimension_numbers<[1], [0], [0], [1], [0, 0, 1, 1], [], []>} : vector<8x512xf32>, vector<512x10xf32>, vector<8x10xf32> -> vector<8x10xf32>
    %c0_3 = arith.constant 0 : index
    %c0_4 = arith.constant 0 : index
    %3 = vector.load %arg3[%c0_3, %c0_4] : memref<1x10xf32, #tpu.memory_space<vmem>>, vector<1x10xf32>
    %4 = vector.broadcast %3 : vector<1x10xf32> to vector<8x10xf32>
    %5 = arith.addf %2, %4 : vector<8x10xf32>
    %cst_5 = arith.constant dense<0xFF800000> : vector<8xf32>
    %6 = vector.multi_reduction <maximumf>, %5, %cst_5 [1] : vector<8x10xf32> to vector<8xf32>
    %7 = vector.shape_cast %6 : vector<8xf32> to vector<8x1xf32>
    %8 = vector.broadcast %7 : vector<8x1xf32> to vector<8x10xf32>
    %9 = arith.subf %5, %8 : vector<8x10xf32>
    %10 = math.exp %9 : vector<8x10xf32>
    %cst_6 = arith.constant dense<0.000000e+00> : vector<8xf32>
    %11 = vector.multi_reduction <add>, %10, %cst_6 [1] : vector<8x10xf32> to vector<8xf32>
    %12 = vector.shape_cast %11 : vector<8xf32> to vector<8x1xf32>
    %13 = vector.broadcast %12 : vector<8x1xf32> to vector<8x10xf32>
    %14 = arith.divf %10, %13 : vector<8x10xf32>
    %c0_7 = arith.constant 0 : index
    %c0_8 = arith.constant 0 : index
    %15 = vector.load %arg4[%c0_7, %c0_8] : memref<8x10xf32, #tpu.memory_space<vmem>>, vector<8x10xf32>
    tpu.vector_store %arg4[%c0_7, %c0_8], %14 {strides = array<i32>} : memref<8x10xf32, #tpu.memory_space<vmem>>, vector<8x10xf32>,
    return
  }
  func.func @transform_0(%arg0: i32) -> (i32, i32) {
    %c0_i32 = arith.constant 0 : i32
    %c0_i32_0 = arith.constant 0 : i32
    return %arg0, %c0_i32 : i32, i32
  }
  func.func @transform_1(%arg0: i32) -> (i32, i32) {
    %c0_i32 = arith.constant 0 : i32
    %c0_i32_0 = arith.constant 0 : i32
    %c0_i32_1 = arith.constant 0 : i32
    return %c0_i32, %c0_i32_0 : i32, i32
  }
  func.func @transform_2(%arg0: i32) -> (i32, i32) {
    %c0_i32 = arith.constant 0 : i32
    %c0_i32_0 = arith.constant 0 : i32
    %c0_i32_1 = arith.constant 0 : i32
    return %c0_i32, %c0_i32_0 : i32, i32
  }
  func.func @transform_3(%arg0: i32) -> (i32, i32) {
    %c0_i32 = arith.constant 0 : i32
    %c0_i32_0 = arith.constant 0 : i32
    return %arg0, %c0_i32 : i32, i32
  }
}

</mosaic_0001>

<bundles_post_ra>
// kernel: output_layer.1
= control target key start
LH: loop header
LB: loop body
LE: loop exit
PB: predicated region body
PF: predicated region fallthrough
CT: control target
= control target key end

     0   :  { %8 = vsyncpa [#allocation3], 0  ;;  %s850_s0 = inlined_call_operand.vmem [shape: f32[16,512], index: 0, kind: input, shape index: {}]   ;;  %s851_s1 = inlined_call_operand.vmem [shape: f32[512,10], index: 1, kind: input, shape index: {}]   ;;  %s852_s2 = inlined_call_operand.vmem [shape: f32[1,10], index: 2, kind: input, shape index: {}]   ;;  %s853_s3 = inlined_call_operand.hbm [shape: f32[16,10], index: 3, kind: output, shape index: {}]  }
   0x1   :  { %10 = vsyncpa [#allocation3 + $0x1], 0  ;;  %s562_s12 = smov 0   ;;  %s564_s13 = smov 0  }
   0x2   :  { %s566_s14 = smov 0   ;;  %s568_s15 = smov 0  }
   0x3 LB: > { %s583_s16 = sadd.s32 4294967295, %s540_s15   ;;  %s422_s17 = sadd.s32 4294967294, %s540_s15   ;;  %s540_s15 = sphi %s568_s15, %s859_s15   ;;  %s536_s14 = sphi %s566_s14, %s858_s14   ;;  %s532_s13 = sphi %s564_s13, %s857_s13   ;;  %s528_s12 = sphi %s562_s12, %s856_s12  }
   0x4   : > { %s587_s18 = sadd.s32 1, %s540_s15   ;;  %s91_s19 = sadd.s32 1, %s536_s14 }
   0x5   : > { %s88_s20 = ssub.s32 %s540_s15, %s587_s18  ;;  %p101_p0 = scmp.ne.s32.totalorder %s536_s14, %s532_s13 }
   0x6   : > { %p89_p1 = scmp.eq.s32.totalorder %s88_s20, 0  ;;  %p102_p2 = scmp.eq.s32.totalorder %s583_s16, 1 }
   0x7   : > { %p107_p3 = scmp.ne.s32.totalorder %s532_s13, %s528_s12  ;;  %p108_p4 = scmp.eq.s32.totalorder %s422_s17, 1 }
   0x8   : > { %s598_s21 = scalar_select %p89_p1, %s536_s14, %s91_s19  }
   0x9   : > { %p600_p5 = por %p102_p2, %p101_p0  ;;  %p604_p6 = por %p108_p4, %p107_p3 }
   0xa   : > { %p425_p7 = scmp.ge.s32.totalorder %s540_s15, 1  ;;  %p140_p8 = scmp.lt.s32.totalorder %s540_s15, 3 }
   0xc   : > { %p141_p9 = pnand %p425_p7, %p140_p8 }
   0xd   : > { %p164_p10 = scmp.lt.s32.totalorder (!%p141_p9), %s583_s16, 1  ;;  %s161_s6 = sand.u32 (!%p141_p9), 1, %s532_s13  }
   0xe   : > { %144 = sbr.rel (%p141_p9) target bundleno = 455 (0x1c7), region = 32  ;;  %s426_s7 = sshll.u32 (!%p141_p9), %s161_s6, 3 }
   0xf   : > { %s430_s8 = sshll.u32 (!%p141_p9), %s583_s16, 3  ;;  %s163_s20 = scalar_lea.vmem (!%p141_p9), [#allocation2], %s426_s7 }
  0x10   : > { %s358_s11 = scalar_lea.hbm (!%p141_p9), %s853_s3, %s430_s8  ;;  %s360_s24 = sshll.u32 (!%p141_p9), %s163_s20, 4  ;;  %s361_s24 = int_to_ptr.vmem [resolvable:$true] %s360_s24 }
  0x11   : > { %s362_s25 = sshll.u32 (!%p141_p9), %s358_s11, 4  ;;  %s498_s29 = scalar_lea.hbm (!%p141_p9), %s853_s3, 16  ;;  %s363_s25 = int_to_ptr.hbm [resolvable:$true] %s362_s25 }
  0x12   : > { %s492_s26 = sshra.s32 (!%p141_p9), %s363_s25, 4  ;;  %s493_s26 = int_to_ptr.hbm [resolvable:$true] %s492_s26 }
  0x13   : > { %v220_v0 = vld [vmem:[%s851_s1 + $0x178] sm:$0xff]  ;;  %v219_v2 = vld [vmem:[%s851_s1 + $0x170] sm:$0xff]  ;;  %v218_v6 = vld [vmem:[%s851_s1 + $0x168] sm:$0xff]  ;;  %s746_s19 = scalar_select %p164_p10, %s583_s16, 1  ;;  %vm321_vm0 = vcmask 80896  }
  0x14   : > { %v188_v1 = vld [vmem:[%s851_s1 + $0x78] sm:$0xff]  ;;  %281 = vmatpush.msra.mxu2 %v220_v0  ;;  %v187_v4 = vld [vmem:[%s851_s1 + $0x70] sm:$0xff]  ;;  %v186_v8 = vld [vmem:[%s851_s1 + $0x68] sm:$0xff]  ;;  %s348_s16 = scalar_lea.sflag [#allocation3], %s161_s6  ;;  %s494_s27 = scalar_lea.hbm %s493_s26, 8 }
  0x15   : > { %241 = vmatpush.msra.mxu0 %v188_v1  ;;  %v236_v3 = vld [vmem:[%s851_s1 + $0x1f8] sm:$0xff]  ;;  %v235_v7 = vld [vmem:[%s851_s1 + $0x1f0] sm:$0xff]  ;;  %v234_v10 = vld [vmem:[%s851_s1 + $0x1e8] sm:$0xff]  ;;  %s433_s17 = sshll.u32 %s746_s19, 5  ;;  %p495_p11 = scmp.ne.s32.totalorder %s493_s26, %s494_s27 }
  0x16   : > { %v204_v5 = vld [vmem:[%s851_s1 + $0xf8] sm:$0xff]  ;;  %301 = vmatpush.msra.mxu3 %v236_v3  ;;  %282 = vmatpush.msra.mxu2 %v219_v2  ;;  %v203_v9 = vld [vmem:[%s851_s1 + $0xf0] sm:$0xff]  ;;  %v217_v11 = vld [vmem:[%s851_s1 + $0x160] sm:$0xff]  ;;  %s168_s9 = scalar_lea.vmem %s850_s0, %s433_s17  ;;  %p499_p0 = scmp.lt.s32.totalorder %s493_s26, %s853_s3 }
  0x17   : > { %261 = vmatpush.msra.mxu1 %v204_v5  ;;  %242 = vmatpush.msra.mxu0 %v187_v4  ;;  %v185_v12 = vld [vmem:[%s851_s1 + $0x60] sm:$0xff]  ;;  %v202_v13 = vld [vmem:[%s851_s1 + $0xe8] sm:$0xff]  ;;  %v216_v16 = vld [vmem:[%s851_s1 + $0x158] sm:$0xff]  ;;  %p496_p12 = pnand %p495_p11, %p600_p5  ;;  %p500_p1 = scmp.lt.s32.totalorder %s498_s29, %s494_s27 }
  0x18   : > { %302 = vmatpush.msra.mxu3 %v235_v7  ;;  %283 = vmatpush.msra.mxu2 %v218_v6  ;;  %v233_v14 = vld [vmem:[%s851_s1 + $0x1e0] sm:$0xff]  ;;  %v184_v17 = vld [vmem:[%s851_s1 + $0x58] sm:$0xff]  ;;  %v215_v20 = vld [vmem:[%s851_s1 + $0x150] sm:$0xff] }
  0x19   : > { %262 = vmatpush.msra.mxu1 %v203_v9  ;;  %243 = vmatpush.msra.mxu0 %v186_v8  ;;  %v201_v15 = vld [vmem:[%s851_s1 + $0xe0] sm:$0xff]  ;;  %v232_v18 = vld [vmem:[%s851_s1 + $0x1d8] sm:$0xff]  ;;  %v183_v21 = vld [vmem:[%s851_s1 + $0x50] sm:$0xff]  ;;  %p497_p13 = pneg %p496_p12  ;;  %p501_p2 = por %p500_p1, %p499_p0 }
  0x1a   : > { %303 = vmatpush.msra.mxu3 %v234_v10  ;;  %284 = vmatpush.msra.mxu2 %v217_v11  ;;  %v200_v19 = vld [vmem:[%s851_s1 + $0xd8] sm:$0xff]  ;;  %v231_v22 = vld [vmem:[%s851_s1 + $0x1d0] sm:$0xff]  ;;  %v214_v24 = vld [vmem:[%s851_s1 + $0x148] sm:$0xff] }
  0x1b   : > { %263 = vmatpush.msra.mxu1 %v202_v13  ;;  %244 = vmatpush.msra.mxu0 %v185_v12  ;;  %v199_v23 = vld [vmem:[%s851_s1 + $0xd0] sm:$0xff]  ;;  %v182_v25 = vld [vmem:[%s851_s1 + $0x48] sm:$0xff]  ;;  %v213_v28 = vld [vmem:[%s851_s1 + $0x140] sm:$0xff]  ;;  %p502_p3 = pnand %p501_p2, %p497_p13 }
  0x1c   : > { %304 = vmatpush.msra.mxu3 %v233_v14  ;;  %285 = vmatpush.msra.mxu2 %v216_v16  ;;  %v230_v26 = vld [vmem:[%s851_s1 + $0x1c8] sm:$0xff]  ;;  %v181_v29 = vld [vmem:[%s851_s1 + $0x40] sm:$0xff]  ;;  %v212_v32 = vld [vmem:[%s851_s1 + $0x138] sm:$0xff] }
  0x1d   : > { %264 = vmatpush.msra.mxu1 %v201_v15  ;;  %245 = vmatpush.msra.mxu0 %v184_v17  ;;  %v198_v27 = vld [vmem:[%s851_s1 + $0xc8] sm:$0xff]  ;;  %v229_v30 = vld [vmem:[%s851_s1 + $0x1c0] sm:$0xff]  ;;  %v180_v33 = vld [vmem:[%s851_s1 + $0x38] sm:$0xff] }
  0x1e   : > { %305 = vmatpush.msra.mxu3 %v232_v18  ;;  %286 = vmatpush.msra.mxu2 %v215_v20  ;;  %v197_v31 = vld [vmem:[%s851_s1 + $0xc0] sm:$0xff]  ;;  %v228_v34 = vld [vmem:[%s851_s1 + $0x1b8] sm:$0xff]  ;;  %v211_v36 = vld [vmem:[%s851_s1 + $0x130] sm:$0xff] }
  0x1f   : > { %265 = vmatpush.msra.mxu1 %v200_v19  ;;  %246 = vmatpush.msra.mxu0 %v183_v21  ;;  %v196_v35 = vld [vmem:[%s851_s1 + $0xb8] sm:$0xff]  ;;  %v179_v37 = vld [vmem:[%s851_s1 + $0x30] sm:$0xff]  ;;  %v210_v40 = vld [vmem:[%s851_s1 + $0x128] sm:$0xff] }
  0x20   : > { %306 = vmatpush.msra.mxu3 %v231_v22  ;;  %287 = vmatpush.msra.mxu2 %v214_v24  ;;  %v227_v38 = vld [vmem:[%s851_s1 + $0x1b0] sm:$0xff]  ;;  %v178_v41 = vld [vmem:[%s851_s1 + $0x28] sm:$0xff]  ;;  %v209_v44 = vld [vmem:[%s851_s1 + $0x120] sm:$0xff] }
  0x21   : > { %266 = vmatpush.msra.mxu1 %v199_v23  ;;  %247 = vmatpush.msra.mxu0 %v182_v25  ;;  %v195_v39 = vld [vmem:[%s851_s1 + $0xb0] sm:$0xff]  ;;  %v226_v42 = vld [vmem:[%s851_s1 + $0x1a8] sm:$0xff]  ;;  %v177_v45 = vld [vmem:[%s851_s1 + $0x20] sm:$0xff] }
  0x22   : > { %307 = vmatpush.msra.mxu3 %v230_v26  ;;  %288 = vmatpush.msra.mxu2 %v213_v28  ;;  %v194_v43 = vld [vmem:[%s851_s1 + $0xa8] sm:$0xff]  ;;  %v225_v46 = vld [vmem:[%s851_s1 + $0x1a0] sm:$0xff]  ;;  %v208_v48 = vld [vmem:[%s851_s1 + $0x118] sm:$0xff] }
  0x23   : > { %267 = vmatpush.msra.mxu1 %v198_v27  ;;  %248 = vmatpush.msra.mxu0 %v181_v29  ;;  %v193_v47 = vld [vmem:[%s851_s1 + $0xa0] sm:$0xff]  ;;  %v176_v49 = vld [vmem:[%s851_s1 + $0x18] sm:$0xff]  ;;  %v207_v52 = vld [vmem:[%s851_s1 + $0x110] sm:$0xff] }
  0x24   : > { %308 = vmatpush.msra.mxu3 %v229_v30  ;;  %289 = vmatpush.msra.mxu2 %v212_v32  ;;  %v224_v50 = vld [vmem:[%s851_s1 + $0x198] sm:$0xff]  ;;  %v175_v53 = vld [vmem:[%s851_s1 + $0x10] sm:$0xff]  ;;  %v206_v56 = vld [vmem:[%s851_s1 + $0x108] sm:$0xff] }
  0x25   : > { %268 = vmatpush.msra.mxu1 %v197_v31  ;;  %249 = vmatpush.msra.mxu0 %v180_v33  ;;  %v192_v51 = vld [vmem:[%s851_s1 + $0x98] sm:$0xff]  ;;  %v223_v54 = vld [vmem:[%s851_s1 + $0x190] sm:$0xff]  ;;  %v174_v57 = vld [vmem:[%s851_s1 + $0x8] sm:$0xff] }
  0x26   : > { %309 = vmatpush.msra.mxu3 %v228_v34  ;;  %290 = vmatpush.msra.mxu2 %v211_v36  ;;  %v191_v55 = vld [vmem:[%s851_s1 + $0x90] sm:$0xff]  ;;  %v222_v58 = vld [vmem:[%s851_s1 + $0x188] sm:$0xff]  ;;  %v205_v60 = vld [vmem:[%s851_s1 + $0x100] sm:$0xff] }
  0x27   : > { %269 = vmatpush.msra.mxu1 %v196_v35  ;;  %250 = vmatpush.msra.mxu0 %v179_v37  ;;  %v190_v59 = vld [vmem:[%s851_s1 + $0x88] sm:$0xff]  ;;  %v173_v61 = vld [vmem:[%s851_s1] sm:$0xff]  ;;  %v171_v62 = vld [vmem:[%s168_s9 + $0x10] sm:$0xff] }
  0x28   : > { %310 = vmatpush.msra.mxu3 %v227_v38  ;;  %291 = vmatpush.msra.mxu2 %v210_v40  ;;  %v221_v63 = vld [vmem:[%s851_s1 + $0x180] sm:$0xff]  ;;  %v172_v1 = vld [vmem:[%s168_s9 + $0x18] sm:$0xff]  ;;  %v170_v3 = vld [vmem:[%s168_s9 + $0x8] sm:$0xff] }
  0x29   : > { %270 = vmatpush.msra.mxu1 %v195_v39  ;;  %251 = vmatpush.msra.mxu0 %v178_v41  ;;  %v169_v0 = vld [vmem:[%s168_s9] sm:$0xff] }
  0x2a   : > { %311 = vmatpush.msra.mxu3 %v226_v42  ;;  %292 = vmatpush.msra.mxu2 %v209_v44  ;;  %v189_v2 = vld [vmem:[%s851_s1 + $0x80] sm:$0xff] }
  0x2b   : > { %271 = vmatpush.msra.mxu1 %v194_v43  ;;  %252 = vmatpush.msra.mxu0 %v177_v45  ;;  %v473_v4 = vld [vmem:[%s852_s2] ss:$0 sm:$0xff] }
  0x2c   : > { %312 = vmatpush.msra.mxu3 %v225_v46  ;;  %293 = vmatpush.msra.mxu2 %v208_v48 }
  0x2d   : > { %272 = vmatpush.msra.mxu1 %v193_v47  ;;  %253 = vmatpush.msra.mxu0 %v176_v49 }
  0x2e   : > { %313 = vmatpush.msra.mxu3 %v224_v50  ;;  %294 = vmatpush.msra.mxu2 %v207_v52 }
  0x2f   : > { %273 = vmatpush.msra.mxu1 %v192_v51  ;;  %254 = vmatpush.msra.mxu0 %v175_v53 }
  0x30   : > { %314 = vmatpush.msra.mxu3 %v223_v54  ;;  %295 = vmatpush.msra.mxu2 %v206_v56 }
  0x31   : > { %274 = vmatpush.msra.mxu1 %v191_v55  ;;  %255 = vmatpush.msra.mxu0 %v174_v57 }
  0x32   : > { %315 = vmatpush.msra.mxu3 %v222_v58  ;;  %296 = vmatpush.msra.mxu2 %v205_v60 }
  0x33   : > { %275 = vmatpush.msra.mxu1 %v190_v59  ;;  %256 = vmatpush.msra.mxu0 %v173_v61 }
  0x34   : > { %297 = vmatmul.f32.vlgmr.msra.gmra.mxu2 %v171_v62  ;;  %316 = vmatpush.msra.mxu3 %v221_v63 }
  0x35   : > { %257 = vmatmul.f32.vlgmr.msra.gmra.mxu0 %v169_v0  ;;  %317 = vmatmul.f32.vlgmr.msra.gmra.mxu3 %v172_v1 }
  0x36   : > { %276 = vmatpush.msra.mxu1 %v189_v2 }
  0x37   : > { %277 = vmatmul.f32.vlgmr.msra.gmra.mxu1 %v170_v3 }
  0xb2   : > { %v258_v5 = vpop.f32.mrf.mxu0 }
  0xb3   : > { %v259_v6 = vadd.f32 %v473_v4, %v258_v5 }
  0xb4   : > { %v278_v7 = vpop.f32.mrf.mxu1 }
  0xb5   : > { %v279_v8 = vadd.f32 %v278_v7, %v259_v6 }
  0xb7   : > { %v298_v9 = vpop.f32.mrf.mxu2 }
  0xb8   : > { %v299_v10 = vadd.f32 %v298_v9, %v279_v8  ;;  %v318_v11 = vpop.f32.mrf.mxu3 }
  0xba   : > { %v319_v12 = vadd.f32 %v318_v11, %v299_v10 }
  0xbc   : > { %v322_v13 = vsel %vm321_vm0, %v319_v12, -inf }
  0xbd   : > { %323 = vmax.xlane.f32.xlu0 %v322_v13 }
 0x130   : > { %v324_v14 = vpop.xlane.xlu0 %323 }
 0x131   : > { %v325_v15 = vsub.f32 %v319_v12, %v324_v14 }
 0x133   : > { %v326_v16 = vmul.f32 1.442695, %v325_v15 }
 0x135   : > { %474 = vpow2.f32 %v326_v16 }
 0x13b   : > { %v475_v17 = vpop.eup %474 }
 0x13c   : > { %v328_v18 = vsel %vm321_vm0, %v475_v17, 0.0 }
 0x13d   : > { %329 = vadd.xlane.f32.xlu0 %v328_v18 }
 0x1b0   : > { %v330_v19 = vpop.xlane.xlu0 %329 }
 0x1b1   : > { %476 = vrcp.f32 %v330_v19  ;;  %v342_v23 = vand.u32 2147483648, %v330_v19  ;;  %v340_v25 = vand.u32 2147483647, %v330_v19  ;;  %vm336_vm2 = vweird.f32 %v330_v19 }
 0x1b3   : > { %v343_v27 = vor.u32 1.1754944e-38, %v342_v23  ;;  %vm341_vm4 = vcmp.eq.f32.partialorder %v340_v25, 8.507059e+37 }
 0x1b7   : > { %v477_v20 = vpop.eup %476 }
 0x1b8   : > { %v332_v21 = vmul.f32 %v477_v20, %v330_v19  ;;  %vm337_vm1 = vweird.f32 %v477_v20 }
 0x1b9   : > { %vm338_vm3 = vmor %vm336_vm2, %vm337_vm1 }
 0x1ba   : > { %v333_v22 = vsub.f32 1.0, %v332_v21 }
 0x1bc   : > { %v334_v24 = vmul.f32 %v477_v20, %v333_v22 }
 0x1be   : > { %v335_v26 = vadd.f32 %v477_v20, %v334_v24 }
 0x1c0   : > { %v339_v28 = vsel %vm338_vm3, %v477_v20, %v335_v26 }
 0x1c1   : > { %v344_v29 = vsel %vm341_vm4, %v343_v27, %v339_v28 }
 0x1c2   : > { %v345_v30 = vmul.f32 %v475_v17, %v344_v29 }
 0x1c4   : > { %346 = vst.msk [vmem:[%s163_s20] sm:$0xff] %vm321_vm0, %v345_v30 }
 0x1c5   : > { %505 = shalt.err (!%p502_p3)
}
 0x1c6   : > { %434 = dma.vmem_to_hbm [thread:$0]  (%p600_p5), %s361_s24, 128, %s363_s25, %s348_s16  }
 0x1c7 PF: > { %p440_p4 = scmp.ge.s32.totalorder %s540_s15, 2  ;;  %s374_s4 = sand.u32 1, %s528_s12  }
 0x1c8   : > { %s375_s5 = scalar_lea.sflag [#allocation3], %s374_s4 }
 0x1c9   : > { %p437_p7 = pnand %p440_p4, %p604_p6 }
 0x1cb   : > { %p438_p8 = pneg %p437_p7 }
 0x1cd   : > { %523 = dma.done.wait (%p438_p8), %s375_s5, 128  }
 0x1ce   : > { %525 = vsyncadd (%p438_p8), %s375_s5, 4294967168  ;;  %p13_p9 = scmp.ge.s32.totalorder %s587_s18, 4   ;;  %s856_s12 = smov %s532_s13 }
 0x1cf   : > { %s857_s13 = smov %s536_s14  ;;  %s858_s14 = smov %s598_s21 }
 0x1d0   : > { %s859_s15 = smov %s587_s18  ;;  %15 = sbr.rel (!%p13_p9) target bundleno = 3 (0x3), region = 67 }
 0x1d5   :  { %381 = vsyncpa [#allocation3], 1 }
 0x1d6   :  { %383 = vsyncpa [#allocation3 + $0x1], 1 }

</bundles_post_ra>
